<compile_context>
chip_gen: v6e
topology: v6e:2x2x1
jax: 0.10.0
libtpu: 0.0.40
codegen_flags: <defaults>
</compile_context>

<pallas_src>
import functools

import jax
import jax.numpy as jnp
from jax.experimental import pallas as pl
from jax.experimental.pallas import tpu as pltpu


def _round_up(x, m):
    return (x + m - 1) // m * m


def _gaussian_sample_kernel(x_ref, w_ref, b_ref, eps_ref, z_ref, mu_ref, lv_ref,
                            *, d_out, d_out_p):
    x = x_ref[...]                                             # (tile_b, d_in) f32

    # One fused MXU matmul for both heads: y = x @ [Wmu^T | Wlv^T] + [bmu | blv]
    y = jnp.dot(x, w_ref[...], preferred_element_type=jnp.float32) + b_ref[...]

    mu = y[:, :d_out]                          # mu head
    lv_pre = y[:, d_out_p:d_out_p + d_out]     # log_var head (starts on a 128-lane boundary)

    # Numerically stable softplus: max(v, 0) + log1p(exp(-|v|))
    log_var = jnp.maximum(lv_pre, 0.0) + jnp.log1p(jnp.exp(-jnp.abs(lv_pre)))

    # std reuses log_var -> one fewer transcendental than the split form.
    std = jnp.exp(0.5 * log_var)

    z = mu + std * eps_ref[...]

    z_ref[...] = z.astype(z_ref.dtype)
    mu_ref[...] = mu.astype(mu_ref.dtype)
    lv_ref[...] = log_var.astype(lv_ref.dtype)


def pack_params(w_mu, b_mu, w_lv, b_lv):
    """Fuse + transpose + lane-pad the two Linear heads.  Call ONCE at init time.

    w_*: (d_out, d_in) PyTorch layout; b_*: (d_out,).
    Returns (W_cat (d_in, 2*d_out_p), b_cat (1, 2*d_out_p), d_out, d_out_p).
    """
    d_out, d_in = w_mu.shape
    d_out_p = _round_up(d_out, 128)            # per-head lane padding for the fused matmul
    w_cat = jnp.zeros((d_in, 2 * d_out_p), jnp.float32)
    w_cat = w_cat.at[:, :d_out].set(jnp.asarray(w_mu, jnp.float32).T)
    w_cat = w_cat.at[:, d_out_p:d_out_p + d_out].set(jnp.asarray(w_lv, jnp.float32).T)
    b_cat = jnp.zeros((1, 2 * d_out_p), jnp.float32)
    b_cat = b_cat.at[0, :d_out].set(jnp.asarray(b_mu, jnp.float32))
    b_cat = b_cat.at[0, d_out_p:d_out_p + d_out].set(jnp.asarray(b_lv, jnp.float32))
    return w_cat, b_cat, d_out, d_out_p


def gaussian_sample(x, packed, key, tile_b=1024):
    """x: (B, d_in); packed = pack_params(...). Returns (z, mu, log_var), each (B, d_out)."""
    w_cat, b_cat, d_out, d_out_p = packed
    x = jnp.asarray(x, jnp.float32)
    B, d_in = x.shape

    # Batch tile: sublane-aligned, large by default (per-grid-step overhead ~0.35us),
    # but capped so the "parallel" axis has >= 2 blocks when B allows it (v7x: 2 TCs).
    max_tile = _round_up(max(8, pl.cdiv(B, 2)), 8)
    tile_b = max(8, min(_round_up(tile_b, 8), max_tile))
    grid = (pl.cdiv(B, tile_b),)

    # eps ~ N(0, 1), generated once outside the kernel (reproducible, no pltpu PRNG).
    eps = jax.random.normal(key, (B, d_out), jnp.float32)

    kernel = functools.partial(_gaussian_sample_kernel, d_out=d_out, d_out_p=d_out_p)
    out_shape = tuple(jax.ShapeDtypeStruct((B, d_out), jnp.float32) for _ in range(3))

    return pl.pallas_call(
        kernel,
        out_shape=out_shape,
        grid=grid,
        in_specs=[
            pl.BlockSpec((tile_b, d_in), lambda i: (i, 0)),            # x tile (pipelined)
            pl.BlockSpec((d_in, 2 * d_out_p), lambda i: (0, 0)),       # fused W (VMEM-resident)
            pl.BlockSpec((1, 2 * d_out_p), lambda i: (0, 0)),          # fused b (VMEM-resident)
            pl.BlockSpec((tile_b, d_out), lambda i: (i, 0)),           # eps tile
        ],
        out_specs=[
            pl.BlockSpec((tile_b, d_out), lambda i: (i, 0)),           # z
            pl.BlockSpec((tile_b, d_out), lambda i: (i, 0)),           # mu
            pl.BlockSpec((tile_b, d_out), lambda i: (i, 0)),           # log_var
        ],
        compiler_params=pltpu.CompilerParams(
            dimension_semantics=("parallel",)),                        # 2 TCs on v7x
    )(x, w_cat, b_cat, eps)


def _init_linear(key, out_dim, in_dim):
    """Deterministic nn.Linear-style init (uniform +-1/sqrt(in_dim))."""
    kw, kb = jax.random.split(key)
    bound = 1.0 / (in_dim ** 0.5)
    w = jax.random.uniform(kw, (out_dim, in_dim), jnp.float32, -bound, bound)
    b = jax.random.uniform(kb, (out_dim,), jnp.float32, -bound, bound)
    return w, b


def _check(x, w_mu, b_mu, w_lv, b_lv, eps, z, mu, log_var):
    mu_ref = x @ w_mu.T + b_mu
    lv_ref = jax.nn.softplus(x @ w_lv.T + b_lv)
    z_ref = mu_ref + jnp.exp(0.5 * lv_ref) * eps
    assert mu.shape == mu_ref.shape and log_var.shape == lv_ref.shape and z.shape == z_ref.shape
    assert jnp.allclose(mu, mu_ref, atol=2e-3, rtol=2e-3), "mu mismatch"
    assert jnp.allclose(log_var, lv_ref, atol=2e-3, rtol=2e-3), "log_var mismatch"
    assert jnp.allclose(z, z_ref, atol=5e-3, rtol=5e-3), "z mismatch"
    assert bool(jnp.all(jnp.isfinite(z))), "non-finite z"


if __name__ == "__main__":
    key = jax.random.PRNGKey(0)
    k_x, k_mu, k_lv, k_e, k_x2, k_mu2, k_lv2, k_e2 = jax.random.split(key, 8)

    # Case 1: module-sized example (B=8, input_dim=32, output_dim=16), single block.
    B, input_dim, output_dim = 8, 32, 16
    x = jax.random.normal(k_x, (B, input_dim), jnp.float32)
    w_mu, b_mu = _init_linear(k_mu, output_dim, input_dim)
    w_lv, b_lv = _init_linear(k_lv, output_dim, input_dim)
    packed = pack_params(w_mu, b_mu, w_lv, b_lv)          # once, outside the hot path
    z, mu, log_var = gaussian_sample(x, packed, k_e)
    jax.block_until_ready((z, mu, log_var))
    eps = jax.random.normal(k_e, (B, output_dim), jnp.float32)
    _check(x, w_mu, b_mu, w_lv, b_lv, eps, z, mu, log_var)

    # Case 2: multi-block grid with a ragged last block (B=40, tile_b=16 -> 3 blocks).
    B2, in2, out2 = 40, 48, 20
    x2 = jax.random.normal(k_x2, (B2, in2), jnp.float32)
    w_mu2, b_mu2 = _init_linear(k_mu2, out2, in2)
    w_lv2, b_lv2 = _init_linear(k_lv2, out2, in2)
    packed2 = pack_params(w_mu2, b_mu2, w_lv2, b_lv2)
    z2, mu2, lv2 = gaussian_sample(x2, packed2, k_e2, tile_b=16)
    jax.block_until_ready((z2, mu2, lv2))
    eps2 = jax.random.normal(k_e2, (B2, out2), jnp.float32)
    _check(x2, w_mu2, b_mu2, w_lv2, b_lv2, eps2, z2, mu2, lv2)

    print("KERNEL_OK")
</pallas_src>

<mosaic_0001>
module attributes {stable_mosaic.version = 11 : i64} {
  func.func @_gaussian_sample_kernel(%arg0: i32, %arg1: memref<8x32xf32, #tpu.memory_space<vmem>>, %arg2: memref<32x256xf32, #tpu.memory_space<vmem>>, %arg3: memref<1x256xf32, #tpu.memory_space<vmem>>, %arg4: memref<8x16xf32, #tpu.memory_space<vmem>>, %arg5: memref<8x16xf32, #tpu.memory_space<vmem>>, %arg6: memref<8x16xf32, #tpu.memory_space<vmem>>, %arg7: memref<8x16xf32, #tpu.memory_space<vmem>>) attributes {dimension_semantics = [#tpu.dimension_semantics<parallel>], iteration_bounds = array<i64: 1>, scalar_prefetch = 0 : i64, scratch_operands = 0 : i64, tpu.core_type = #tpu.core_type<tc>, window_params = [{transform_indices = @transform_0, window_bounds = array<i64: 8, 32>}, {pipeline_mode = #tpu.pipeline_mode<synchronous>, transform_indices = @transform_1, window_bounds = array<i64: 32, 256>}, {pipeline_mode = #tpu.pipeline_mode<synchronous>, transform_indices = @transform_2, window_bounds = array<i64: 1, 256>}, {transform_indices = @transform_3, window_bounds = array<i64: 8, 16>}, {transform_indices = @transform_4, window_bounds = array<i64: 8, 16>}, {transform_indices = @transform_5, window_bounds = array<i64: 8, 16>}, {transform_indices = @transform_6, window_bounds = array<i64: 8, 16>}]} {
    %c0 = arith.constant 0 : index
    %c0_0 = arith.constant 0 : index
    %0 = vector.load %arg1[%c0, %c0_0] : memref<8x32xf32, #tpu.memory_space<vmem>>, vector<8x32xf32>
    %c0_1 = arith.constant 0 : index
    %c0_2 = arith.constant 0 : index
    %1 = vector.load %arg2[%c0_1, %c0_2] : memref<32x256xf32, #tpu.memory_space<vmem>>, vector<32x256xf32>
    %cst = arith.constant dense<0.000000e+00> : vector<8x256xf32>
    %2 = tpu.matmul %0, %1, %cst {dimension_numbers = #tpu.dot_dimension_numbers<[1], [0], [0], [1], [0, 0, 1, 1], [], []>} : vector<8x32xf32>, vector<32x256xf32>, vector<8x256xf32> -> vector<8x256xf32>
    %c0_3 = arith.constant 0 : index
    %c0_4 = arith.constant 0 : index
    %3 = vector.load %arg3[%c0_3, %c0_4] : memref<1x256xf32, #tpu.memory_space<vmem>>, vector<1x256xf32>
    %4 = vector.broadcast %3 : vector<1x256xf32> to vector<8x256xf32>
    %5 = arith.addf %2, %4 : vector<8x256xf32>
    %6 = vector.extract_strided_slice %5 {offsets = [0, 0], sizes = [8, 16], strides = [1, 1]} : vector<8x256xf32> to vector<8x16xf32>
    %7 = vector.extract_strided_slice %5 {offsets = [0, 128], sizes = [8, 16], strides = [1, 1]} : vector<8x256xf32> to vector<8x16xf32>
    %cst_5 = arith.constant 0.000000e+00 : f32
    %8 = vector.broadcast %cst_5 : f32 to vector<8x16xf32>
    %9 = arith.maximumf %7, %8 : vector<8x16xf32>
    %10 = math.absf %7 : vector<8x16xf32>
    %cst_6 = arith.constant 0.000000e+00 : f32
    %11 = vector.broadcast %cst_6 : f32 to vector<8x16xf32>
    %12 = arith.subf %11, %10 : vector<8x16xf32>
    %13 = math.exp %12 : vector<8x16xf32>
    %14 = math.log1p %13 : vector<8x16xf32>
    %15 = arith.addf %9, %14 : vector<8x16xf32>
    %cst_7 = arith.constant 5.000000e-01 : f32
    %16 = vector.broadcast %cst_7 : f32 to vector<8x16xf32>
    %17 = arith.mulf %16, %15 : vector<8x16xf32>
    %18 = math.exp %17 : vector<8x16xf32>
    %c0_8 = arith.constant 0 : index
    %c0_9 = arith.constant 0 : index
    %19 = vector.load %arg4[%c0_8, %c0_9] : memref<8x16xf32, #tpu.memory_space<vmem>>, vector<8x16xf32>
    %20 = arith.mulf %18, %19 : vector<8x16xf32>
    %21 = arith.addf %6, %20 : vector<8x16xf32>
    %c0_10 = arith.constant 0 : index
    %c0_11 = arith.constant 0 : index
    %22 = vector.load %arg5[%c0_10, %c0_11] : memref<8x16xf32, #tpu.memory_space<vmem>>, vector<8x16xf32>
    tpu.vector_store %arg5[%c0_10, %c0_11], %21 {strides = array<i32>} : memref<8x16xf32, #tpu.memory_space<vmem>>, vector<8x16xf32>,
    %c0_12 = arith.constant 0 : index
    %c0_13 = arith.constant 0 : index
    %23 = vector.load %arg6[%c0_12, %c0_13] : memref<8x16xf32, #tpu.memory_space<vmem>>, vector<8x16xf32>
    tpu.vector_store %arg6[%c0_12, %c0_13], %6 {strides = array<i32>} : memref<8x16xf32, #tpu.memory_space<vmem>>, vector<8x16xf32>,
    %c0_14 = arith.constant 0 : index
    %c0_15 = arith.constant 0 : index
    %24 = vector.load %arg7[%c0_14, %c0_15] : memref<8x16xf32, #tpu.memory_space<vmem>>, vector<8x16xf32>
    tpu.vector_store %arg7[%c0_14, %c0_15], %15 {strides = array<i32>} : memref<8x16xf32, #tpu.memory_space<vmem>>, vector<8x16xf32>,
    return
  }
  func.func @transform_0(%arg0: i32) -> (i32, i32) {
    %c0_i32 = arith.constant 0 : i32
    %c0_i32_0 = arith.constant 0 : i32
    return %arg0, %c0_i32 : i32, i32
  }
  func.func @transform_1(%arg0: i32) -> (i32, i32) {
    %c0_i32 = arith.constant 0 : i32
    %c0_i32_0 = arith.constant 0 : i32
    %c0_i32_1 = arith.constant 0 : i32
    return %c0_i32, %c0_i32_0 : i32, i32
  }
  func.func @transform_2(%arg0: i32) -> (i32, i32) {
    %c0_i32 = arith.constant 0 : i32
    %c0_i32_0 = arith.constant 0 : i32
    %c0_i32_1 = arith.constant 0 : i32
    return %c0_i32, %c0_i32_0 : i32, i32
  }
  func.func @transform_3(%arg0: i32) -> (i32, i32) {
    %c0_i32 = arith.constant 0 : i32
    %c0_i32_0 = arith.constant 0 : i32
    return %arg0, %c0_i32 : i32, i32
  }
  func.func @transform_4(%arg0: i32) -> (i32, i32) {
    %c0_i32 = arith.constant 0 : i32
    %c0_i32_0 = arith.constant 0 : i32
    return %arg0, %c0_i32 : i32, i32
  }
  func.func @transform_5(%arg0: i32) -> (i32, i32) {
    %c0_i32 = arith.constant 0 : i32
    %c0_i32_0 = arith.constant 0 : i32
    return %arg0, %c0_i32 : i32, i32
  }
  func.func @transform_6(%arg0: i32) -> (i32, i32) {
    %c0_i32 = arith.constant 0 : i32
    %c0_i32_0 = arith.constant 0 : i32
    return %arg0, %c0_i32 : i32, i32
  }
}

</mosaic_0001>

<bundles_post_ra>
// kernel: tpu_custom_call.1
= control target key start
LH: loop header
LB: loop body
LE: loop exit
PB: predicated region body
PF: predicated region fallthrough
CT: control target
= control target key end

     0   :  { %12 = vsyncpa [#allocation3], 0  ;;  %s435_s0 = inlined_call_operand.hbm [shape: f32[8,32], index: 0, kind: input, shape index: {}]   ;;  %s436_s1 = inlined_call_operand.hbm [shape: f32[32,256], index: 1, kind: input, shape index: {}]   ;;  %s437_s2 = inlined_call_operand.vmem [shape: f32[1,256], index: 2, kind: input, shape index: {}]   ;;  %s438_s3 = inlined_call_operand.hbm [shape: f32[8,16], index: 3, kind: input, shape index: {}]   ;;  %s439_s4 = inlined_call_operand.hbm [shape: f32[8,16], index: 4, kind: output, shape index: {0}]   ;;  %s440_s5 = inlined_call_operand.hbm [shape: f32[8,16], index: 5, kind: output, shape index: {1}]   ;;  %s441_s6 = inlined_call_operand.hbm [shape: f32[8,16], index: 6, kind: output, shape index: {2}]  }
   0x1   :  { %13 = vsyncpa [#allocation6], 0 }
   0x2   :  { %14 = vsyncpa [#allocation4], 0 }
   0x3   :  { %15 = vsyncpa [#allocation10], 0  ;;  %s367_s21 = smov [#allocation5]  }
   0x4   :  { %s31_s22 = sshll.u32 %s367_s21, 4  ;;  %s32_s22 = int_to_ptr.vmem [resolvable:$true] %s31_s22 }
   0x5   :  { %s247_s23 = scalar_lea.vmem %s32_s22, 1024  ;;  %p252_p1 = scmp.lt.s32.totalorder %s32_s22, %s32_s22 }
   0x6   :  { %p248_p0 = scmp.ne.s32.totalorder %s32_s22, %s247_s23  ;;  %p253_p2 = scmp.lt.s32.totalorder %s247_s23, %s247_s23 }
   0x8   :  { %p254_p3 = por %p253_p2, %p252_p1 }
   0xa   :  { %p255_p4 = pnand %p254_p3, %p248_p0 }
   0xc   :  { %258 = shalt.err (!%p255_p4)
}
   0xd   :  { %s368_s24 = smov 256   ;;  %s369_s25 = smov 16  }
   0xe   :  { %37 = dma.hbm_to_vmem [thread:$0]  %s436_s1, 1024, %s32_s22, [#allocation6], %s368_s24, %s368_s24, %s369_s25  }
   0xf   :  { %s370_s28 = smov [#allocation2]   ;;  %s371_s30 = smov [#allocation7]  }
  0x10   :  { %s22_s29 = sshll.u32 %s370_s28, 4  ;;  %s46_s7 = sshll.u32 %s371_s30, 4  ;;  %s23_s29 = int_to_ptr.vmem [resolvable:$true] %s22_s29  ;;  %s47_s7 = int_to_ptr.vmem [resolvable:$true] %s46_s7 }
  0x11   :  { %s267_s8 = scalar_lea.vmem %s23_s29, 128  ;;  %p272_p6 = scmp.lt.s32.totalorder %s23_s29, %s23_s29 }
  0x12   :  { %p268_p5 = scmp.ne.s32.totalorder %s23_s29, %s267_s8  ;;  %p273_p7 = scmp.lt.s32.totalorder %s267_s8, %s267_s8 }
  0x14   :  { %p274_p8 = por %p273_p7, %p272_p6 }
  0x16   :  { %p275_p9 = pnand %p274_p8, %p268_p5 }
  0x18   :  { %278 = shalt.err (!%p275_p9)
}
  0x19   :  { %25 = dma.hbm_to_vmem [thread:$0]  %s435_s0, 128, %s23_s29, [#allocation3]  }
  0x1a   :  { %s287_s11 = scalar_lea.vmem %s47_s7, 128  ;;  %p292_p11 = scmp.lt.s32.totalorder %s47_s7, %s47_s7 }
  0x1b   :  { %p288_p10 = scmp.ne.s32.totalorder %s47_s7, %s287_s11  ;;  %p293_p12 = scmp.lt.s32.totalorder %s287_s11, %s287_s11 }
  0x1d   :  { %p294_p13 = por %p293_p12, %p292_p11 }
  0x1f   :  { %p295_p0 = pnand %p294_p13, %p288_p10 }
  0x21   :  { %298 = shalt.err (!%p295_p0)
}
  0x22   :  { %49 = dma.hbm_to_vmem [thread:$0]  %s438_s3, 128, %s47_s7, [#allocation6]  }
  0x23   :  { %359 = dma.done.wait [#allocation3], 128  }
  0x24   :  { %360 = vsyncadd [#allocation3], 4294967168 }
  0x25   :  { %361 = dma.done.wait [#allocation6], 1152  }
  0x26   :  { %362 = vsyncadd [#allocation6], 4294966144  ;;  %v372_v0 = vmov 0.0   ;;  %v67_v1 = vld [vmem:[#allocation5 + $0x38] sm:$0xff]  ;;  %v66_v2 = vld [vmem:[#allocation5 + $0x30] sm:$0xff]  ;;  %vm80_vm0 = vcmask 261120   ;;  %v70_v10 = vlaneseq }
  0x27   :  { %148 = vmatprep.mubr.f32.mxu0 %v372_v0  ;;  %v65_v3 = vld [vmem:[#allocation5 + $0x28] sm:$0xff]  ;;  %108 = vmatprep.subr.mxu0 %v67_v1  ;;  %v64_v4 = vld [vmem:[#allocation5 + $0x20] sm:$0xff]  ;;  %v63_v5 = vld [vmem:[#allocation5 + $0x18] sm:$0xff]  ;;  %s373_s13 = smov [#allocation9]   ;;  %vm176_vm1 = vcmask 130048  }
  0x28   :  { %109 = vmatpush1.msra.mxu0 %v66_v2  ;;  %v62_v6 = vld [vmem:[#allocation5 + $0x10] sm:$0xff]  ;;  %v61_v7 = vld [vmem:[#allocation5 + $0x8] sm:$0xff]  ;;  %v60_v8 = vld [vmem:[#allocation5] sm:$0xff]  ;;  %v71_v11 = vshrl.u32 %v70_v10, 7  ;;  %s196_s14 = sshll.u32 %s373_s13, 4  ;;  %s197_s14 = int_to_ptr.vmem [resolvable:$true] %s196_s14 }
  0x29   :  { %110 = vmatprep.subr.mxu0 %v65_v3  ;;  %v59_v9 = vld [vmem:[#allocation2] sm:$0xff]  ;;  %s299_s15 = scalar_lea.vmem %s197_s14, 128  ;;  %p304_p2 = scmp.lt.s32.totalorder %s197_s14, %s197_s14 }
  0x2a   :  { %111 = vmatpush1.msra.mxu0 %v64_v4  ;;  %v72_v12 = vsub.s32 0, %v71_v11  ;;  %v68_v13 = vld [vmem:[%s437_s2] sm:$0x3]  ;;  %v76_v14 = vsub.s32 1, %v71_v11  ;;  %p300_p1 = scmp.ne.s32.totalorder %s197_s14, %s299_s15  ;;  %p305_p3 = scmp.lt.s32.totalorder %s299_s15, %s299_s15 }
  0x2b   :  { %112 = vmatprep.subr.mxu0 %v63_v5 }
  0x2c   :  { %113 = vmatpush1.msra.mxu0 %v62_v6  ;;  %v73_v15 = vrot.slane %v68_v13, %v72_v12  ;;  %v77_v16 = vrot.slane %v68_v13, %v76_v14  ;;  %p306_p4 = por %p305_p3, %p304_p2 }
  0x2d   :  { %114 = vmatprep.subr.mxu0 %v61_v7 }
  0x2e   :  { %115 = vmatpush1.msra.mxu0 %v60_v8  ;;  %p307_p5 = pnand %p306_p4, %p300_p1 }
  0x2f   :  { %223 = vmatmul.mubr.msk.f32.vlgmr.msra.gmra.mxu0 %vm80_vm0, %v59_v9 }
  0xef   :  { %v150_v17 = vpop.f32.mrf.mxu0 }
  0xf0   :  { %v151_v18 = vadd.f32 %v150_v17, %v73_v15 }
  0xf1   :  { %v152_v19 = vpop.f32.mrf.mxu0 }
  0xf2   :  { %v153_v20 = vadd.f32 %v152_v19, %v77_v16  ;;  %178 = vst.msk [vmem:[#allocation9] sm:$0xff] %vm176_vm1, %v151_v18 }
  0xf3   :  { %310 = shalt.err (!%p307_p5)
}
  0xf4   :  { %199 = dma.vmem_to_hbm [thread:$0]  %s197_s14, 128, %s440_s5, [#allocation10]   ;;  %v156_v21 = vand.u32 2147483647, %v153_v20  ;;  %v155_v32 = vmax.f32 %v153_v20, 0.0 }
  0xf5   :  { %s374_s17 = smov [#allocation11]  }
  0xf6   :  { %v157_v22 = vsub.f32 0.0, %v156_v21  ;;  %s206_s18 = sshll.u32 %s374_s17, 4  ;;  %s207_s18 = int_to_ptr.vmem [resolvable:$true] %s206_s18 }
  0xf7   :  { %s319_s5 = scalar_lea.vmem %s207_s18, 128  ;;  %p324_p7 = scmp.lt.s32.totalorder %s207_s18, %s207_s18 }
  0xf8   :  { %v158_v23 = vmul.f32 1.442695, %v157_v22  ;;  %p320_p6 = scmp.ne.s32.totalorder %s207_s18, %s319_s5  ;;  %p325_p8 = scmp.lt.s32.totalorder %s319_s5, %s319_s5 }
  0xfa   :  { %233 = vpow2.f32 %v158_v23  ;;  %p326_p9 = por %p325_p8, %p324_p7 }
  0xfc   :  { %p327_p10 = pnand %p326_p9, %p320_p6 }
 0x107   :  { %v234_v24 = vpop.eup %233 }
 0x108   :  { %v160_v25 = vadd.f32 1.0, %v234_v24  ;;  %v163_v26 = vmul.f32 -0.5, %v234_v24  ;;  %v166_v28 = vand.u32 2147483647, %v234_v24 }
 0x10a   :  { %235 = vlog2.f32 %v160_v25  ;;  %v164_v27 = vadd.f32 1.0, %v163_v26  ;;  %vm167_vm2 = vcmp.lt.f32.partialorder %v166_v28, 0.0004427343 }
 0x10c   :  { %v165_v31 = vmul.f32 %v234_v24, %v164_v27 }
 0x117   :  { %v236_v29 = vpop.eup %235 }
 0x118   :  { %v162_v30 = vmul.f32 0.6931472, %v236_v29 }
 0x11a   :  { %v168_v33 = vsel %vm167_vm2, %v165_v31, %v162_v30 }
 0x11b   :  { %v169_v34 = vadd.f32 %v168_v33, %v155_v32 }
 0x11d   :  { %v170_v35 = vmul.f32 0.5, %v169_v34  ;;  %179 = vst.msk [vmem:[#allocation11] sm:$0xff] %vm176_vm1, %v169_v34 }
 0x11e   :  { %330 = shalt.err (!%p327_p10)
}
 0x11f   :  { %209 = dma.vmem_to_hbm [thread:$0]  %s207_s18, 128, %s441_s6, [#allocation10]   ;;  %v171_v36 = vmul.f32 1.442695, %v170_v35  ;;  %v173_v37 = vld [vmem:[#allocation7] sm:$0xff] }
 0x120   :  { %s375_s21 = smov [#allocation8]  }
 0x121   :  { %237 = vpow2.f32 %v171_v36  ;;  %s186_s22 = sshll.u32 %s375_s21, 4  ;;  %s187_s22 = int_to_ptr.vmem [resolvable:$true] %s186_s22 }
 0x122   :  { %s339_s23 = scalar_lea.vmem %s187_s22, 128  ;;  %p344_p12 = scmp.lt.s32.totalorder %s187_s22, %s187_s22 }
 0x123   :  { %p340_p11 = scmp.ne.s32.totalorder %s187_s22, %s339_s23  ;;  %p345_p13 = scmp.lt.s32.totalorder %s339_s23, %s339_s23 }
 0x125   :  { %p346_p0 = por %p345_p13, %p344_p12 }
 0x127   :  { %p347_p1 = pnand %p346_p0, %p340_p11 }
 0x12e   :  { %v238_v38 = vpop.eup %237 }
 0x12f   :  { %v174_v39 = vmul.f32 %v238_v38, %v173_v37 }
 0x131   :  { %v175_v40 = vadd.f32 %v174_v39, %v151_v18 }
 0x133   :  { %177 = vst.msk [vmem:[#allocation8] sm:$0xff] %vm176_vm1, %v175_v40 }
 0x134   :  { %350 = shalt.err (!%p347_p1)
}
 0x135   :  { %189 = dma.vmem_to_hbm [thread:$0]  %s187_s22, 128, %s439_s4, [#allocation4]  }
 0x136   :  { %363 = dma.done.wait [#allocation4], 128  }
 0x137   :  { %364 = vsyncadd [#allocation4], 4294967168 }
 0x138   :  { %365 = dma.done.wait [#allocation10], 256  }
 0x139   :  { %366 = vsyncadd [#allocation10], 4294967040 }
 0x13a   :  { %219 = vsyncpa [#allocation3], 1 }
 0x13b   :  { %220 = vsyncpa [#allocation6], 1 }
 0x13c   :  { %221 = vsyncpa [#allocation4], 1 }
 0x13d   :  { %222 = vsyncpa [#allocation10], 1 }

</bundles_post_ra>
